<compile_context>
chip_gen: v5e
topology: v5e:2x2
jax: 0.10.0
libtpu: 0.0.40
codegen_flags: <defaults>
</compile_context>

<pallas_src>
import functools

import jax
import jax.numpy as jnp
from jax.experimental import pallas as pl
from jax.experimental.pallas import tpu as pltpu

KSIZE = 3
NEG_SLOPE = 0.2


def _vmem_capacity_bytes():
    """Per-core VMEM capacity; conservative fallback if the query fails."""
    try:
        info = pltpu.get_tpu_info()
        cap = getattr(info, "vmem_capacity_bytes", None)
        if cap:
            return int(cap)
    except Exception:
        pass
    return 64 * 1024 * 1024  # v7x-sized conservative default


def _estimate_step_vmem(nb, cin, cout, hw, compute_dtype):
    """Rough per-grid-step VMEM footprint for an (NB, C, H*W) step."""
    cb = jnp.dtype(compute_dtype).itemsize
    in_block = 2 * nb * cin * hw * 4            # f32 input block, double buffered
    out_block = 2 * nb * cout * hw * 4          # f32 output block, double buffered
    weights = KSIZE * cout * KSIZE * cin * cb   # Buffered(1)
    masks = KSIZE * KSIZE * hw * cb             # Buffered(1)
    biasb = cout * 128 * 4                      # padded bias tile
    # in-kernel temporaries (per batch element, rough peak):
    #   cast copy + one 3x slab + one shifted tap + f32 accumulator (x2 slack)
    temps = (cin * hw * cb) + (3 * cin * hw * cb) + (cin * hw * cb) + 2 * cout * hw * 4
    return in_block + out_block + weights + masks + biasb + temps


def _pick_batch_block(n, cin, cout, hw, compute_dtype, budget):
    """Largest divisor of n whose per-step blocks fit the VMEM budget."""
    best = 1
    for nb in range(1, n + 1):
        if n % nb:
            continue
        if _estimate_step_vmem(nb, cin, cout, hw, compute_dtype) <= budget:
            best = nb
    return best


def _edge_masks(height, width, dtype):
    """(9, 1, H*W) 0/1 masks: tap (dh, dw) is valid iff its source pixel
    (h+dh-1, w+dw-1) lies inside the image (this implements the zero padding)."""
    rows = jnp.arange(height, dtype=jnp.int32)
    cols = jnp.arange(width, dtype=jnp.int32)
    masks = []
    for dh in range(KSIZE):
        vr = (rows + (dh - 1) >= 0) & (rows + (dh - 1) <= height - 1)     # (H,)
        for dw in range(KSIZE):
            vc = (cols + (dw - 1) >= 0) & (cols + (dw - 1) <= width - 1)  # (W,)
            masks.append((vr[:, None] & vc[None, :]).reshape(height * width))
    m = jnp.stack(masks).astype(dtype)
    return m.reshape(KSIZE * KSIZE, 1, height * width)


def _resident_spec(block_shape, index_map):
    """BlockSpec for operands whose block never changes across the grid:
    single-buffered (halves VMEM footprint) when pipeline_mode is supported."""
    try:
        return pl.BlockSpec(block_shape, index_map, pipeline_mode=pl.Buffered(1))
    except Exception:  # older jax without pipeline_mode / Buffered(1)
        return pl.BlockSpec(block_shape, index_map)


def _conv_block_kernel(x_ref, w_ref, b_ref, m_ref, o_ref, *, width, compute_dtype):
    """One batch-block grid step.

    x_ref: (NB, Cin, H*W)     activations, input dtype, lane-dense flat spatial
    w_ref: (3, Cout, 3*Cin)   weights, [dh][co, dw*Cin + ci], compute dtype
    b_ref: (Cout, 1)          bias, f32
    m_ref: (9, 1, H*W)        0/1 edge masks per (dh, dw) tap, compute dtype
    o_ref: (NB, Cout, H*W)    output, f32, lane-dense
    """
    nb = x_ref.shape[0]
    hw = x_ref.shape[2]

    bias = b_ref[...]                                        # (Cout, 1) f32

    for n in range(nb):                                      # static, small
        x = x_ref[n].astype(compute_dtype)                   # (Cin, H*W)
        acc = None
        for dh in range(KSIZE):
            pieces = []
            for dw in range(KSIZE):
                shift = (dh - 1) * width + (dw - 1)
                if shift == 0:
                    tap = x                                  # center tap: no shift/mask
                else:
                    # tap[:, p] = x[:, p + shift]; wrapped values are zeroed by the mask
                    tap = pltpu.roll(x, shift=(-shift) % hw, axis=1)
                    tap = tap * m_ref[dh * KSIZE + dw]       # zero-pad edges
                pieces.append(tap)
            slab = jnp.concatenate(pieces, axis=0)           # (3*Cin, H*W)
            contrib = jnp.dot(w_ref[dh], slab,
                              preferred_element_type=jnp.float32)  # (Cout, H*W) f32
            acc = contrib if acc is None else acc + contrib
        acc = acc + bias                                     # bias, f32
        acc = jnp.where(acc >= 0, acc, NEG_SLOPE * acc)      # LeakyReLU(0.2), f32
        o_ref[n] = acc.astype(o_ref.dtype)


def conv_block_forward(x_nchw, weight, bias, *, compute_dtype=jnp.float32):
    """Matches PyTorch ConvBlock.forward (Conv2d 3x3 s=1 p=1 + LeakyReLU(0.2)).

    x_nchw: (N, Cin, H, W) float32
    weight: (Cout, Cin, 3, 3) float32 (PyTorch Conv2d layout)
    bias:   (Cout,) float32
    compute_dtype: dtype of the MXU operands (f32 default; bf16 for v6e/v7x).
    returns (N, Cout, H, W) float32
    """
    n, cin, height, width = x_nchw.shape
    cout = weight.shape[0]
    hw = height * width

    # Free reshape: no HBM pass, no padding pass.
    x_flat = x_nchw.reshape(n, cin, hw)

    # (Cout, Cin, 3, 3) -> (dh, Cout, dw, Cin) -> (3, Cout, 3*Cin); the K-axis
    # ordering (dw-major, then ci) matches the in-kernel slab concatenation.
    w3 = jnp.transpose(weight, (2, 0, 3, 1)).reshape(KSIZE, cout, KSIZE * cin)
    w3 = w3.astype(compute_dtype)
    b2d = bias.reshape(cout, 1).astype(jnp.float32)
    masks = _edge_masks(height, width, compute_dtype)

    cap = _vmem_capacity_bytes()
    nb = _pick_batch_block(n, cin, cout, hw, compute_dtype, budget=int(cap * 0.5))
    est = _estimate_step_vmem(nb, cin, cout, hw, compute_dtype)
    vmem_limit = int(min(int(cap * 0.9), max(2 * est, 32 * 1024 * 1024)))

    flops = 2 * n * cout * cin * KSIZE * KSIZE * hw
    bytes_accessed = (n * cin * hw * 4                      # activations in
                      + n * cout * hw * 4                   # activations out
                      + w3.size * jnp.dtype(compute_dtype).itemsize
                      + b2d.size * 4
                      + masks.size * jnp.dtype(compute_dtype).itemsize)

    kernel = functools.partial(_conv_block_kernel, width=width,
                               compute_dtype=compute_dtype)

    out_flat = pl.pallas_call(
        kernel,
        out_shape=jax.ShapeDtypeStruct((n, cout, hw), jnp.float32),
        grid_spec=pltpu.PrefetchScalarGridSpec(
            num_scalar_prefetch=0,
            grid=(n // nb,),
            in_specs=[
                pl.BlockSpec((nb, cin, hw), lambda b: (b, 0, 0)),
                _resident_spec((KSIZE, cout, KSIZE * cin), lambda b: (0, 0, 0)),
                _resident_spec((cout, 1), lambda b: (0, 0)),
                _resident_spec((KSIZE * KSIZE, 1, hw), lambda b: (0, 0, 0)),
            ],
            out_specs=pl.BlockSpec((nb, cout, hw), lambda b: (b, 0, 0)),
        ),
        compiler_params=pltpu.CompilerParams(
            dimension_semantics=("parallel",),
            vmem_limit_bytes=vmem_limit,
        ),
        cost_estimate=pl.CostEstimate(flops=flops, transcendentals=0,
                                      bytes_accessed=bytes_accessed),
    )(x_flat, w3, b2d, masks)

    return out_flat.reshape(n, cout, height, width)


def _reference_forward(x_nchw, weight, bias):
    """Pure-JAX reference (same semantics as torch Conv2d 3x3 p=1 + LeakyReLU(0.2))."""
    out = jax.lax.conv_general_dilated(
        x_nchw, weight,
        window_strides=(1, 1),
        padding=((1, 1), (1, 1)),
        dimension_numbers=("NCHW", "OIHW", "NCHW"),
        precision=jax.lax.Precision.HIGHEST,
    )
    out = out + bias.reshape(1, -1, 1, 1)
    return jnp.where(out >= 0, out, NEG_SLOPE * out)


if __name__ == "__main__":
    # Small shapes consistent with ConvBlock(ndims=2, in=4, out=8, stride=1).
    N, CIN, COUT, H, W = 2, 4, 8, 16, 16

    key = jax.random.PRNGKey(0)
    kx, kw, kb = jax.random.split(key, 3)
    x = jax.random.normal(kx, (N, CIN, H, W), dtype=jnp.float32)
    fan_in = CIN * KSIZE * KSIZE
    bound = 1.0 / (fan_in ** 0.5)
    weight = jax.random.uniform(kw, (COUT, CIN, KSIZE, KSIZE),
                                minval=-bound, maxval=bound, dtype=jnp.float32)
    bias = jax.random.uniform(kb, (COUT,), minval=-bound, maxval=bound,
                              dtype=jnp.float32)

    ref = jax.block_until_ready(_reference_forward(x, weight, bias))

    # f32 path (default): matches the PyTorch module numerics.
    out = jax.block_until_ready(conv_block_forward(x, weight, bias))
    assert out.shape == (N, COUT, H, W)
    assert jnp.allclose(out, ref, atol=2e-2, rtol=2e-2), (
        f"f32 path max abs err {float(jnp.max(jnp.abs(out - ref)))}")

    # bf16 MXU operands (v6e/v7x fast path), f32 accumulation + f32 epilogue.
    out_bf16 = jax.block_until_ready(
        conv_block_forward(x, weight, bias, compute_dtype=jnp.bfloat16))
    assert out_bf16.shape == (N, COUT, H, W)
    assert jnp.allclose(out_bf16, ref, atol=1e-1, rtol=1e-1), (
        f"bf16 path max abs err {float(jnp.max(jnp.abs(out_bf16 - ref)))}")

    print("KERNEL_OK")
</pallas_src>

<mosaic_0001>
module attributes {stable_mosaic.version = 11 : i64} {
  func.func @_conv_block_kernel(%arg0: i32, %arg1: memref<2x4x256xf32, #tpu.memory_space<vmem>>, %arg2: memref<3x8x12xf32, #tpu.memory_space<vmem>>, %arg3: memref<8x1xf32, #tpu.memory_space<vmem>>, %arg4: memref<9x1x256xf32, #tpu.memory_space<vmem>>, %arg5: memref<2x8x256xf32, #tpu.memory_space<vmem>>) attributes {dimension_semantics = [#tpu.dimension_semantics<parallel>], iteration_bounds = array<i64: 1>, scalar_prefetch = 0 : i64, scratch_operands = 0 : i64, tpu.core_type = #tpu.core_type<tc>, window_params = [{transform_indices = @transform_0, window_bounds = array<i64: 2, 4, 256>}, {pipeline_mode = #tpu.pipeline_mode<synchronous>, transform_indices = @transform_1, window_bounds = array<i64: 3, 8, 12>}, {pipeline_mode = #tpu.pipeline_mode<synchronous>, transform_indices = @transform_2, window_bounds = array<i64: 8, 1>}, {pipeline_mode = #tpu.pipeline_mode<synchronous>, transform_indices = @transform_3, window_bounds = array<i64: 9, 1, 256>}, {transform_indices = @transform_4, window_bounds = array<i64: 2, 8, 256>}]} {
    %c0 = arith.constant 0 : index
    %c0_0 = arith.constant 0 : index
    %0 = vector.load %arg3[%c0, %c0_0] : memref<8x1xf32, #tpu.memory_space<vmem>>, vector<8x1xf32>
    %c0_1 = arith.constant 0 : index
    %c0_2 = arith.constant 0 : index
    %c0_3 = arith.constant 0 : index
    %1 = vector.load %arg1[%c0_1, %c0_2, %c0_3] : memref<2x4x256xf32, #tpu.memory_space<vmem>>, vector<1x4x256xf32>
    %2 = vector.shape_cast %1 : vector<1x4x256xf32> to vector<4x256xf32>
    %c17_i32 = arith.constant 17 : i32
    %3 = tpu.dynamic_rotate %2 by %c17_i32 dim 1 : vector<4x256xf32>, i32 -> vector<4x256xf32>
    %c0_4 = arith.constant 0 : index
    %c0_5 = arith.constant 0 : index
    %c0_6 = arith.constant 0 : index
    %4 = vector.load %arg4[%c0_4, %c0_5, %c0_6] : memref<9x1x256xf32, #tpu.memory_space<vmem>>, vector<1x1x256xf32>
    %5 = vector.shape_cast %4 : vector<1x1x256xf32> to vector<1x256xf32>
    %6 = vector.broadcast %5 : vector<1x256xf32> to vector<4x256xf32>
    %7 = arith.mulf %3, %6 : vector<4x256xf32>
    %c16_i32 = arith.constant 16 : i32
    %8 = tpu.dynamic_rotate %2 by %c16_i32 dim 1 : vector<4x256xf32>, i32 -> vector<4x256xf32>
    %c1 = arith.constant 1 : index
    %c0_7 = arith.constant 0 : index
    %c0_8 = arith.constant 0 : index
    %9 = vector.load %arg4[%c1, %c0_7, %c0_8] : memref<9x1x256xf32, #tpu.memory_space<vmem>>, vector<1x1x256xf32>
    %10 = vector.shape_cast %9 : vector<1x1x256xf32> to vector<1x256xf32>
    %11 = vector.broadcast %10 : vector<1x256xf32> to vector<4x256xf32>
    %12 = arith.mulf %8, %11 : vector<4x256xf32>
    %c15_i32 = arith.constant 15 : i32
    %13 = tpu.dynamic_rotate %2 by %c15_i32 dim 1 : vector<4x256xf32>, i32 -> vector<4x256xf32>
    %c2 = arith.constant 2 : index
    %c0_9 = arith.constant 0 : index
    %c0_10 = arith.constant 0 : index
    %14 = vector.load %arg4[%c2, %c0_9, %c0_10] : memref<9x1x256xf32, #tpu.memory_space<vmem>>, vector<1x1x256xf32>
    %15 = vector.shape_cast %14 : vector<1x1x256xf32> to vector<1x256xf32>
    %16 = vector.broadcast %15 : vector<1x256xf32> to vector<4x256xf32>
    %17 = arith.mulf %13, %16 : vector<4x256xf32>
    %18 = tpu.concatenate %7, %12, %17 in 0 : vector<4x256xf32>, vector<4x256xf32>, vector<4x256xf32> -> vector<12x256xf32>
    %c0_11 = arith.constant 0 : index
    %c0_12 = arith.constant 0 : index
    %c0_13 = arith.constant 0 : index
    %19 = vector.load %arg2[%c0_11, %c0_12, %c0_13] : memref<3x8x12xf32, #tpu.memory_space<vmem>>, vector<1x8x12xf32>
    %20 = vector.shape_cast %19 : vector<1x8x12xf32> to vector<8x12xf32>
    %cst = arith.constant dense<0.000000e+00> : vector<8x256xf32>
    %21 = tpu.matmul %20, %18, %cst {dimension_numbers = #tpu.dot_dimension_numbers<[1], [0], [0], [1], [0, 0, 1, 1], [], []>} : vector<8x12xf32>, vector<12x256xf32>, vector<8x256xf32> -> vector<8x256xf32>
    %c1_i32 = arith.constant 1 : i32
    %22 = tpu.dynamic_rotate %2 by %c1_i32 dim 1 : vector<4x256xf32>, i32 -> vector<4x256xf32>
    %c3 = arith.constant 3 : index
    %c0_14 = arith.constant 0 : index
    %c0_15 = arith.constant 0 : index
    %23 = vector.load %arg4[%c3, %c0_14, %c0_15] : memref<9x1x256xf32, #tpu.memory_space<vmem>>, vector<1x1x256xf32>
    %24 = vector.shape_cast %23 : vector<1x1x256xf32> to vector<1x256xf32>
    %25 = vector.broadcast %24 : vector<1x256xf32> to vector<4x256xf32>
    %26 = arith.mulf %22, %25 : vector<4x256xf32>
    %c255_i32 = arith.constant 255 : i32
    %27 = tpu.dynamic_rotate %2 by %c255_i32 dim 1 : vector<4x256xf32>, i32 -> vector<4x256xf32>
    %c5 = arith.constant 5 : index
    %c0_16 = arith.constant 0 : index
    %c0_17 = arith.constant 0 : index
    %28 = vector.load %arg4[%c5, %c0_16, %c0_17] : memref<9x1x256xf32, #tpu.memory_space<vmem>>, vector<1x1x256xf32>
    %29 = vector.shape_cast %28 : vector<1x1x256xf32> to vector<1x256xf32>
    %30 = vector.broadcast %29 : vector<1x256xf32> to vector<4x256xf32>
    %31 = arith.mulf %27, %30 : vector<4x256xf32>
    %32 = tpu.concatenate %26, %2, %31 in 0 : vector<4x256xf32>, vector<4x256xf32>, vector<4x256xf32> -> vector<12x256xf32>
    %c1_18 = arith.constant 1 : index
    %c0_19 = arith.constant 0 : index
    %c0_20 = arith.constant 0 : index
    %33 = vector.load %arg2[%c1_18, %c0_19, %c0_20] : memref<3x8x12xf32, #tpu.memory_space<vmem>>, vector<1x8x12xf32>
    %34 = vector.shape_cast %33 : vector<1x8x12xf32> to vector<8x12xf32>
    %cst_21 = arith.constant dense<0.000000e+00> : vector<8x256xf32>
    %35 = tpu.matmul %34, %32, %cst_21 {dimension_numbers = #tpu.dot_dimension_numbers<[1], [0], [0], [1], [0, 0, 1, 1], [], []>} : vector<8x12xf32>, vector<12x256xf32>, vector<8x256xf32> -> vector<8x256xf32>
    %36 = arith.addf %21, %35 : vector<8x256xf32>
    %c241_i32 = arith.constant 241 : i32
    %37 = tpu.dynamic_rotate %2 by %c241_i32 dim 1 : vector<4x256xf32>, i32 -> vector<4x256xf32>
    %c6 = arith.constant 6 : index
    %c0_22 = arith.constant 0 : index
    %c0_23 = arith.constant 0 : index
    %38 = vector.load %arg4[%c6, %c0_22, %c0_23] : memref<9x1x256xf32, #tpu.memory_space<vmem>>, vector<1x1x256xf32>
    %39 = vector.shape_cast %38 : vector<1x1x256xf32> to vector<1x256xf32>
    %40 = vector.broadcast %39 : vector<1x256xf32> to vector<4x256xf32>
    %41 = arith.mulf %37, %40 : vector<4x256xf32>
    %c240_i32 = arith.constant 240 : i32
    %42 = tpu.dynamic_rotate %2 by %c240_i32 dim 1 : vector<4x256xf32>, i32 -> vector<4x256xf32>
    %c7 = arith.constant 7 : index
    %c0_24 = arith.constant 0 : index
    %c0_25 = arith.constant 0 : index
    %43 = vector.load %arg4[%c7, %c0_24, %c0_25] : memref<9x1x256xf32, #tpu.memory_space<vmem>>, vector<1x1x256xf32>
    %44 = vector.shape_cast %43 : vector<1x1x256xf32> to vector<1x256xf32>
    %45 = vector.broadcast %44 : vector<1x256xf32> to vector<4x256xf32>
    %46 = arith.mulf %42, %45 : vector<4x256xf32>
    %c239_i32 = arith.constant 239 : i32
    %47 = tpu.dynamic_rotate %2 by %c239_i32 dim 1 : vector<4x256xf32>, i32 -> vector<4x256xf32>
    %c8 = arith.constant 8 : index
    %c0_26 = arith.constant 0 : index
    %c0_27 = arith.constant 0 : index
    %48 = vector.load %arg4[%c8, %c0_26, %c0_27] : memref<9x1x256xf32, #tpu.memory_space<vmem>>, vector<1x1x256xf32>
    %49 = vector.shape_cast %48 : vector<1x1x256xf32> to vector<1x256xf32>
    %50 = vector.broadcast %49 : vector<1x256xf32> to vector<4x256xf32>
    %51 = arith.mulf %47, %50 : vector<4x256xf32>
    %52 = tpu.concatenate %41, %46, %51 in 0 : vector<4x256xf32>, vector<4x256xf32>, vector<4x256xf32> -> vector<12x256xf32>
    %c2_28 = arith.constant 2 : index
    %c0_29 = arith.constant 0 : index
    %c0_30 = arith.constant 0 : index
    %53 = vector.load %arg2[%c2_28, %c0_29, %c0_30] : memref<3x8x12xf32, #tpu.memory_space<vmem>>, vector<1x8x12xf32>
    %54 = vector.shape_cast %53 : vector<1x8x12xf32> to vector<8x12xf32>
    %cst_31 = arith.constant dense<0.000000e+00> : vector<8x256xf32>
    %55 = tpu.matmul %54, %52, %cst_31 {dimension_numbers = #tpu.dot_dimension_numbers<[1], [0], [0], [1], [0, 0, 1, 1], [], []>} : vector<8x12xf32>, vector<12x256xf32>, vector<8x256xf32> -> vector<8x256xf32>
    %56 = arith.addf %36, %55 : vector<8x256xf32>
    %57 = vector.broadcast %0 : vector<8x1xf32> to vector<8x256xf32>
    %58 = arith.addf %56, %57 : vector<8x256xf32>
    %cst_32 = arith.constant 0.000000e+00 : f32
    %59 = vector.broadcast %cst_32 : f32 to vector<8x256xf32>
    %60 = arith.cmpf oge, %58, %59 : vector<8x256xf32>
    %cst_33 = arith.constant 2.000000e-01 : f32
    %61 = vector.broadcast %cst_33 : f32 to vector<8x256xf32>
    %62 = arith.mulf %61, %58 : vector<8x256xf32>
    %63 = arith.select %60, %58, %62 : vector<8x256xi1>, vector<8x256xf32>
    %c0_34 = arith.constant 0 : index
    %c0_35 = arith.constant 0 : index
    %c0_36 = arith.constant 0 : index
    %64 = vector.load %arg5[%c0_34, %c0_35, %c0_36] : memref<2x8x256xf32, #tpu.memory_space<vmem>>, vector<1x8x256xf32>
    %65 = vector.shape_cast %64 : vector<1x8x256xf32> to vector<8x256xf32>
    %66 = vector.shape_cast %63 : vector<8x256xf32> to vector<1x8x256xf32>
    tpu.vector_store %arg5[%c0_34, %c0_35, %c0_36], %66 {strides = array<i32>} : memref<2x8x256xf32, #tpu.memory_space<vmem>>, vector<1x8x256xf32>,
    %c1_37 = arith.constant 1 : index
    %c0_38 = arith.constant 0 : index
    %c0_39 = arith.constant 0 : index
    %67 = vector.load %arg1[%c1_37, %c0_38, %c0_39] : memref<2x4x256xf32, #tpu.memory_space<vmem>>, vector<1x4x256xf32>
    %68 = vector.shape_cast %67 : vector<1x4x256xf32> to vector<4x256xf32>
    %c17_i32_40 = arith.constant 17 : i32
    %69 = tpu.dynamic_rotate %68 by %c17_i32_40 dim 1 : vector<4x256xf32>, i32 -> vector<4x256xf32>
    %c0_41 = arith.constant 0 : index
    %c0_42 = arith.constant 0 : index
    %c0_43 = arith.constant 0 : index
    %70 = vector.load %arg4[%c0_41, %c0_42, %c0_43] : memref<9x1x256xf32, #tpu.memory_space<vmem>>, vector<1x1x256xf32>
    %71 = vector.shape_cast %70 : vector<1x1x256xf32> to vector<1x256xf32>
    %72 = vector.broadcast %71 : vector<1x256xf32> to vector<4x256xf32>
    %73 = arith.mulf %69, %72 : vector<4x256xf32>
    %c16_i32_44 = arith.constant 16 : i32
    %74 = tpu.dynamic_rotate %68 by %c16_i32_44 dim 1 : vector<4x256xf32>, i32 -> vector<4x256xf32>
    %c1_45 = arith.constant 1 : index
    %c0_46 = arith.constant 0 : index
    %c0_47 = arith.constant 0 : index
    %75 = vector.load %arg4[%c1_45, %c0_46, %c0_47] : memref<9x1x256xf32, #tpu.memory_space<vmem>>, vector<1x1x256xf32>
    %76 = vector.shape_cast %75 : vector<1x1x256xf32> to vector<1x256xf32>
    %77 = vector.broadcast %76 : vector<1x256xf32> to vector<4x256xf32>
    %78 = arith.mulf %74, %77 : vector<4x256xf32>
    %c15_i32_48 = arith.constant 15 : i32
    %79 = tpu.dynamic_rotate %68 by %c15_i32_48 dim 1 : vector<4x256xf32>, i32 -> vector<4x256xf32>
    %c2_49 = arith.constant 2 : index
    %c0_50 = arith.constant 0 : index
    %c0_51 = arith.constant 0 : index
    %80 = vector.load %arg4[%c2_49, %c0_50, %c0_51] : memref<9x1x256xf32, #tpu.memory_space<vmem>>, vector<1x1x256xf32>
    %81 = vector.shape_cast %80 : vector<1x1x256xf32> to vector<1x256xf32>
    %82 = vector.broadcast %81 : vector<1x256xf32> to vector<4x256xf32>
    %83 = arith.mulf %79, %82 : vector<4x256xf32>
    %84 = tpu.concatenate %73, %78, %83 in 0 : vector<4x256xf32>, vector<4x256xf32>, vector<4x256xf32> -> vector<12x256xf32>
    %c0_52 = arith.constant 0 : index
    %c0_53 = arith.constant 0 : index
    %c0_54 = arith.constant 0 : index
    %85 = vector.load %arg2[%c0_52, %c0_53, %c0_54] : memref<3x8x12xf32, #tpu.memory_space<vmem>>, vector<1x8x12xf32>
    %86 = vector.shape_cast %85 : vector<1x8x12xf32> to vector<8x12xf32>
    %cst_55 = arith.constant dense<0.000000e+00> : vector<8x256xf32>
    %87 = tpu.matmul %86, %84, %cst_55 {dimension_numbers = #tpu.dot_dimension_numbers<[1], [0], [0], [1], [0, 0, 1, 1], [], []>} : vector<8x12xf32>, vector<12x256xf32>, vector<8x256xf32> -> vector<8x256xf32>
    %c1_i32_56 = arith.constant 1 : i32
    %88 = tpu.dynamic_rotate %68 by %c1_i32_56 dim 1 : vector<4x256xf32>, i32 -> vector<4x256xf32>
    %c3_57 = arith.constant 3 : index
    %c0_58 = arith.constant 0 : index
    %c0_59 = arith.constant 0 : index
    %89 = vector.load %arg4[%c3_57, %c0_58, %c0_59] : memref<9x1x256xf32, #tpu.memory_space<vmem>>, vector<1x1x256xf32>
    %90 = vector.shape_cast %89 : vector<1x1x256xf32> to vector<1x256xf32>
    %91 = vector.broadcast %90 : vector<1x256xf32> to vector<4x256xf32>
    %92 = arith.mulf %88, %91 : vector<4x256xf32>
    %c255_i32_60 = arith.constant 255 : i32
    %93 = tpu.dynamic_rotate %68 by %c255_i32_60 dim 1 : vector<4x256xf32>, i32 -> vector<4x256xf32>
    %c5_61 = arith.constant 5 : index
    %c0_62 = arith.constant 0 : index
    %c0_63 = arith.constant 0 : index
    %94 = vector.load %arg4[%c5_61, %c0_62, %c0_63] : memref<9x1x256xf32, #tpu.memory_space<vmem>>, vector<1x1x256xf32>
    %95 = vector.shape_cast %94 : vector<1x1x256xf32> to vector<1x256xf32>
    %96 = vector.broadcast %95 : vector<1x256xf32> to vector<4x256xf32>
    %97 = arith.mulf %93, %96 : vector<4x256xf32>
    %98 = tpu.concatenate %92, %68, %97 in 0 : vector<4x256xf32>, vector<4x256xf32>, vector<4x256xf32> -> vector<12x256xf32>
    %c1_64 = arith.constant 1 : index
    %c0_65 = arith.constant 0 : index
    %c0_66 = arith.constant 0 : index
    %99 = vector.load %arg2[%c1_64, %c0_65, %c0_66] : memref<3x8x12xf32, #tpu.memory_space<vmem>>, vector<1x8x12xf32>
    %100 = vector.shape_cast %99 : vector<1x8x12xf32> to vector<8x12xf32>
    %cst_67 = arith.constant dense<0.000000e+00> : vector<8x256xf32>
    %101 = tpu.matmul %100, %98, %cst_67 {dimension_numbers = #tpu.dot_dimension_numbers<[1], [0], [0], [1], [0, 0, 1, 1], [], []>} : vector<8x12xf32>, vector<12x256xf32>, vector<8x256xf32> -> vector<8x256xf32>
    %102 = arith.addf %87, %101 : vector<8x256xf32>
    %c241_i32_68 = arith.constant 241 : i32
    %103 = tpu.dynamic_rotate %68 by %c241_i32_68 dim 1 : vector<4x256xf32>, i32 -> vector<4x256xf32>
    %c6_69 = arith.constant 6 : index
    %c0_70 = arith.constant 0 : index
    %c0_71 = arith.constant 0 : index
    %104 = vector.load %arg4[%c6_69, %c0_70, %c0_71] : memref<9x1x256xf32, #tpu.memory_space<vmem>>, vector<1x1x256xf32>
    %105 = vector.shape_cast %104 : vector<1x1x256xf32> to vector<1x256xf32>
    %106 = vector.broadcast %105 : vector<1x256xf32> to vector<4x256xf32>
    %107 = arith.mulf %103, %106 : vector<4x256xf32>
    %c240_i32_72 = arith.constant 240 : i32
    %108 = tpu.dynamic_rotate %68 by %c240_i32_72 dim 1 : vector<4x256xf32>, i32 -> vector<4x256xf32>
    %c7_73 = arith.constant 7 : index
    %c0_74 = arith.constant 0 : index
    %c0_75 = arith.constant 0 : index
    %109 = vector.load %arg4[%c7_73, %c0_74, %c0_75] : memref<9x1x256xf32, #tpu.memory_space<vmem>>, vector<1x1x256xf32>
    %110 = vector.shape_cast %109 : vector<1x1x256xf32> to vector<1x256xf32>
    %111 = vector.broadcast %110 : vector<1x256xf32> to vector<4x256xf32>
    %112 = arith.mulf %108, %111 : vector<4x256xf32>
    %c239_i32_76 = arith.constant 239 : i32
    %113 = tpu.dynamic_rotate %68 by %c239_i32_76 dim 1 : vector<4x256xf32>, i32 -> vector<4x256xf32>
    %c8_77 = arith.constant 8 : index
    %c0_78 = arith.constant 0 : index
    %c0_79 = arith.constant 0 : index
    %114 = vector.load %arg4[%c8_77, %c0_78, %c0_79] : memref<9x1x256xf32, #tpu.memory_space<vmem>>, vector<1x1x256xf32>
    %115 = vector.shape_cast %114 : vector<1x1x256xf32> to vector<1x256xf32>
    %116 = vector.broadcast %115 : vector<1x256xf32> to vector<4x256xf32>
    %117 = arith.mulf %113, %116 : vector<4x256xf32>
    %118 = tpu.concatenate %107, %112, %117 in 0 : vector<4x256xf32>, vector<4x256xf32>, vector<4x256xf32> -> vector<12x256xf32>
    %c2_80 = arith.constant 2 : index
    %c0_81 = arith.constant 0 : index
    %c0_82 = arith.constant 0 : index
    %119 = vector.load %arg2[%c2_80, %c0_81, %c0_82] : memref<3x8x12xf32, #tpu.memory_space<vmem>>, vector<1x8x12xf32>
    %120 = vector.shape_cast %119 : vector<1x8x12xf32> to vector<8x12xf32>
    %cst_83 = arith.constant dense<0.000000e+00> : vector<8x256xf32>
    %121 = tpu.matmul %120, %118, %cst_83 {dimension_numbers = #tpu.dot_dimension_numbers<[1], [0], [0], [1], [0, 0, 1, 1], [], []>} : vector<8x12xf32>, vector<12x256xf32>, vector<8x256xf32> -> vector<8x256xf32>
    %122 = arith.addf %102, %121 : vector<8x256xf32>
    %123 = vector.broadcast %0 : vector<8x1xf32> to vector<8x256xf32>
    %124 = arith.addf %122, %123 : vector<8x256xf32>
    %cst_84 = arith.constant 0.000000e+00 : f32
    %125 = vector.broadcast %cst_84 : f32 to vector<8x256xf32>
    %126 = arith.cmpf oge, %124, %125 : vector<8x256xf32>
    %cst_85 = arith.constant 2.000000e-01 : f32
    %127 = vector.broadcast %cst_85 : f32 to vector<8x256xf32>
    %128 = arith.mulf %127, %124 : vector<8x256xf32>
    %129 = arith.select %126, %124, %128 : vector<8x256xi1>, vector<8x256xf32>
    %c1_86 = arith.constant 1 : index
    %c0_87 = arith.constant 0 : index
    %c0_88 = arith.constant 0 : index
    %130 = vector.load %arg5[%c1_86, %c0_87, %c0_88] : memref<2x8x256xf32, #tpu.memory_space<vmem>>, vector<1x8x256xf32>
    %131 = vector.shape_cast %130 : vector<1x8x256xf32> to vector<8x256xf32>
    %132 = vector.shape_cast %129 : vector<8x256xf32> to vector<1x8x256xf32>
    tpu.vector_store %arg5[%c1_86, %c0_87, %c0_88], %132 {strides = array<i32>} : memref<2x8x256xf32, #tpu.memory_space<vmem>>, vector<1x8x256xf32>,
    return
  }
  func.func @transform_0(%arg0: i32) -> (i32, i32, i32) {
    %c0_i32 = arith.constant 0 : i32
    %c0_i32_0 = arith.constant 0 : i32
    %c0_i32_1 = arith.constant 0 : i32
    return %arg0, %c0_i32, %c0_i32_0 : i32, i32, i32
  }
  func.func @transform_1(%arg0: i32) -> (i32, i32, i32) {
    %c0_i32 = arith.constant 0 : i32
    %c0_i32_0 = arith.constant 0 : i32
    %c0_i32_1 = arith.constant 0 : i32
    %c0_i32_2 = arith.constant 0 : i32
    return %c0_i32, %c0_i32_0, %c0_i32_1 : i32, i32, i32
  }
  func.func @transform_2(%arg0: i32) -> (i32, i32) {
    %c0_i32 = arith.constant 0 : i32
    %c0_i32_0 = arith.constant 0 : i32
    %c0_i32_1 = arith.constant 0 : i32
    return %c0_i32, %c0_i32_0 : i32, i32
  }
  func.func @transform_3(%arg0: i32) -> (i32, i32, i32) {
    %c0_i32 = arith.constant 0 : i32
    %c0_i32_0 = arith.constant 0 : i32
    %c0_i32_1 = arith.constant 0 : i32
    %c0_i32_2 = arith.constant 0 : i32
    return %c0_i32, %c0_i32_0, %c0_i32_1 : i32, i32, i32
  }
  func.func @transform_4(%arg0: i32) -> (i32, i32, i32) {
    %c0_i32 = arith.constant 0 : i32
    %c0_i32_0 = arith.constant 0 : i32
    %c0_i32_1 = arith.constant 0 : i32
    return %arg0, %c0_i32, %c0_i32_0 : i32, i32, i32
  }
}

</mosaic_0001>

<bundles_post_ra>
// kernel: tpu_custom_call.1
= control target key start
LH: loop header
LB: loop body
LE: loop exit
PB: predicated region body
PF: predicated region fallthrough
CT: control target
= control target key end

     0   :  { %9 = vsyncpa [#allocation3], 0  ;;  %s1182_s0 = inlined_call_operand.hbm [shape: f32[2,4,256], index: 0, kind: input, shape index: {}]   ;;  %s1183_s1 = inlined_call_operand.hbm [shape: f32[3,8,12], index: 1, kind: input, shape index: {}]   ;;  %s1184_s2 = inlined_call_operand.vmem [shape: f32[8,1], index: 2, kind: input, shape index: {}]   ;;  %s1185_s3 = inlined_call_operand.hbm [shape: f32[9,1,256], index: 3, kind: input, shape index: {}]   ;;  %s1186_s4 = inlined_call_operand.hbm [shape: f32[2,8,256], index: 4, kind: output, shape index: {}]  }
   0x1   :  { %10 = vsyncpa [#allocation6], 0 }
   0x2   :  { %11 = vsyncpa [#allocation4], 0  ;;  %s29_s17 = sshll.u32 %s1183_s1, 4  ;;  %s940_s18 = smov [#allocation5]   ;;  %s30_s17 = int_to_ptr.hbm [resolvable:$true] %s29_s17 }
   0x3   :  { %s31_s19 = sshll.u32 %s940_s18, 4  ;;  %s16_s22 = sshll.u32 %s1182_s0, 4  ;;  %s32_s19 = int_to_ptr.vmem [resolvable:$true] %s31_s19  ;;  %s17_s22 = int_to_ptr.hbm [resolvable:$true] %s16_s22 }
   0x4   :  { %s941_s23 = smov 128   ;;  %s942_s24 = smov 8  }
   0x5   :  { %37 = dma.hbm_to_vmem [thread:$0]  %s30_s17, 384, %s32_s19, [#allocation6], %s941_s23, %s941_s23, %s942_s24  }
   0x6   :  { %s943_s25 = smov [#allocation2]   ;;  %s44_s29 = sshll.u32 %s1185_s3, 4  ;;  %s45_s29 = int_to_ptr.hbm [resolvable:$true] %s44_s29 }
   0x7   :  { %s18_s26 = sshll.u32 %s943_s25, 4  ;;  %s944_s1 = smov [#allocation7]   ;;  %s19_s26 = int_to_ptr.vmem [resolvable:$true] %s18_s26 }
   0x8   :  { %24 = dma.hbm_to_vmem [thread:$0]  %s17_s22, 256, %s19_s26, [#allocation3], %s941_s23, %s941_s23, %s942_s24  }
   0x9   :  { %s46_s30 = sshll.u32 %s944_s1, 4  ;;  %s945_s5 = smov 32   ;;  %s47_s30 = int_to_ptr.vmem [resolvable:$true] %s46_s30 }
   0xa   :  { %s946_s6 = smov 2  }
   0xb   :  { %52 = dma.hbm_to_vmem [thread:$0]  %s45_s29, 288, %s47_s30, [#allocation6], %s945_s5, %s945_s5, %s946_s6  }
   0xc   :  { %934 = dma.done.wait [#allocation3], 256  }
   0xd   :  { %935 = vsyncadd [#allocation3], 4294967040 }
   0xe   :  { %936 = dma.done.wait [#allocation6], 672  }
   0xf   :  { %937 = vsyncadd [#allocation6], 4294966624  ;;  %v66_v0 = vld [vmem:[#allocation2] sm:$0xff]  ;;  %s947_s0 = smov 17   ;;  %s948_s3 = smov 16   ;;  %v433_v17 = vld [vmem:[#allocation2 + $0x8] sm:$0xff]  ;;  %v77_v34 = vlaneseq }
  0x10   :  { %68 = vst [vmem:[#allocation1] ss:$2 sm:$0xff] %v66_v0  ;;  %s949_s7 = smov 15   ;;  %s950_s8 = smov 1   ;;  %v103_v38 = vld [vmem:[#allocation7 + $0x2] sm:$0x3] }
  0x11   :  { %s951_s9 = smov 127   ;;  %s952_s10 = smov 113   ;;  %v1031_v37 = vand.u32 127, %v77_v34  ;;  %v105_v41 = vperm.slane %v103_v38, 0  ;;  %v106_v42 = vperm.slane %v103_v38, 1  ;;  %vm138_vm4 = vcmask 1043456  }
  0x12   :  { %s953_s11 = smov 112   ;;  %s954_s12 = smov 111   ;;  %v82_v45 = vld [vmem:[#allocation7] sm:$0x3]  ;;  %v124_v51 = vld [vmem:[#allocation7 + $0x4] sm:$0x3] }
  0x13   :  { %vm99_vm0 = vcmp.lt.s32.totalorder %v1031_v37, 16  ;;  %vm79_vm1 = vcmp.lt.s32.totalorder %v1031_v37, 17  ;;  %v84_v50 = vperm.slane %v82_v45, 0  ;;  %v85_v53 = vperm.slane %v82_v45, 1  ;;  %v306_v38 = vld [vmem:[#allocation7 + $0xc] sm:$0x3] }
  0x14   :  { %vm120_vm2 = vcmp.lt.s32.totalorder %v1031_v37, 15  ;;  %v126_v58 = vperm.slane %v124_v51, 0  ;;  %v127_v59 = vperm.slane %v124_v51, 1  ;;  %vm151_vm3 = vcmp.lt.s32.totalorder %v1031_v37, 1  ;;  %s780_s18 = sshll.u32 %s1186_s4, 4  ;;  %s957_s19 = smov 256   ;;  %s781_s18 = int_to_ptr.hbm [resolvable:$true] %s780_s18 }
  0x15   :  { %vm172_vm5 = vcmp.lt.s32.totalorder %v1031_v37, 127  ;;  %vm323_vm6 = vcmp.lt.s32.totalorder %v1031_v37, 112  ;;  %vm302_vm7 = vcmp.lt.s32.totalorder %v1031_v37, 113  ;;  %vm344_vm8 = vcmp.lt.s32.totalorder %v1031_v37, 111 }
  0x16   :  { %vm194_vm9 = vcmask 97280  }
  0x17   :  { %v69_v1 = vld.sshfl [vmem:[#allocation1] sm:$0xff pattern:$0x75316420]  ;;  %v70_v2 = vld.sshfl [vmem:[#allocation1 + $0x8] sm:$0xff pattern:$0x75316420] }
  0x18   :  { %90 = vst [vmem:[#allocation1] ss:$2 sm:$0xff] %v66_v0  ;;  %73 = vrot.lane.b32.xlu2 %v69_v1, %s947_s0 }
  0x1f   :  { %v91_v3 = vld.sshfl [vmem:[#allocation1] sm:$0xff pattern:$0x75316420]  ;;  %v92_v4 = vld.sshfl [vmem:[#allocation1 + $0x8] sm:$0xff pattern:$0x75316420] }
  0x20   :  { %95 = vrot.lane.b32.xlu0 %v91_v3, %s948_s3  ;;  %111 = vst [vmem:[#allocation1] ss:$2 sm:$0xff] %v66_v0  ;;  %75 = vrot.lane.b32.xlu2 %v70_v2, %s947_s0  ;;  %v155_v2 = vld [vmem:[#allocation7 + $0x6] sm:$0x3] }
  0x27   :  { %v112_v5 = vld.sshfl [vmem:[#allocation1] sm:$0xff pattern:$0x75316420]  ;;  %v113_v6 = vld.sshfl [vmem:[#allocation1 + $0x8] sm:$0xff pattern:$0x75316420] }
  0x28   :  { %97 = vrot.lane.b32.xlu0 %v92_v4, %s948_s3  ;;  %116 = vrot.lane.b32.xlu1 %v112_v5, %s949_s7  ;;  %142 = vst [vmem:[#allocation1] ss:$2 sm:$0xff] %v66_v0 }
  0x2f   :  { %v144_v7 = vld.sshfl [vmem:[#allocation1 + $0x8] sm:$0xff pattern:$0x75316420]  ;;  %v143_v8 = vld.sshfl [vmem:[#allocation1] sm:$0xff pattern:$0x75316420] }
  0x30   :  { %149 = vrot.lane.b32.xlu0 %v144_v7, %s950_s8  ;;  %163 = vst [vmem:[#allocation1] ss:$2 sm:$0xff] %v66_v0  ;;  %118 = vrot.lane.b32.xlu1 %v113_v6, %s949_s7  ;;  %v157_v7 = vperm.slane %v155_v2, 0 }
  0x31   :  { %147 = vrot.lane.b32.xlu2 %v143_v8, %s950_s8  ;;  %v158_v8 = vperm.slane %v155_v2, 1 }
  0x37   :  { %v164_v9 = vld.sshfl [vmem:[#allocation1] sm:$0xff pattern:$0x75316420]  ;;  %v165_v10 = vld.sshfl [vmem:[#allocation1 + $0x8] sm:$0xff pattern:$0x75316420] }
  0x38   :  { %168 = vrot.lane.b32.xlu0 %v164_v9, %s951_s9  ;;  %170 = vrot.lane.b32.xlu1 %v165_v10, %s951_s9  ;;  %185 = vst [vmem:[#allocation1 + $0x1] ss:$2 sm:$0xff] %v66_v0 }
  0x3f   :  { %v1002_v11 = vld.sshfl [vmem:[#allocation1] sm:$0xff pattern:$0x75316420]  ;;  %v1004_v12 = vld.sshfl [vmem:[#allocation1 + $0x8] sm:$0xff pattern:$0x75316420] }
  0x40   :  { %293 = vst [vmem:[#allocation1] ss:$2 sm:$0xff] %v66_v0 }
  0x47   :  { %v294_v13 = vld.sshfl [vmem:[#allocation1] sm:$0xff pattern:$0x75316420]  ;;  %v295_v14 = vld.sshfl [vmem:[#allocation1 + $0x8] sm:$0xff pattern:$0x75316420] }
  0x48   :  { %298 = vrot.lane.b32.xlu0 %v294_v13, %s952_s10  ;;  %300 = vrot.lane.b32.xlu1 %v295_v14, %s952_s10  ;;  %314 = vst [vmem:[#allocation1] ss:$2 sm:$0xff] %v66_v0  ;;  %v176_v13 = vld [vmem:[#allocation7 + $0xa] sm:$0x3] }
  0x4f   :  { %v316_v15 = vld.sshfl [vmem:[#allocation1 + $0x8] sm:$0xff pattern:$0x75316420]  ;;  %v315_v16 = vld.sshfl [vmem:[#allocation1] sm:$0xff pattern:$0x75316420] }
  0x50   :  { %321 = vrot.lane.b32.xlu0 %v316_v15, %s953_s11  ;;  %335 = vst [vmem:[#allocation1] ss:$2 sm:$0xff] %v66_v0  ;;  %319 = vrot.lane.b32.xlu2 %v315_v16, %s953_s11 }
  0x57   :  { %v337_v18 = vld.sshfl [vmem:[#allocation1 + $0x8] sm:$0xff pattern:$0x75316420]  ;;  %v336_v19 = vld.sshfl [vmem:[#allocation1] sm:$0xff pattern:$0x75316420] }
  0x58   :  { %340 = vrot.lane.b32.xlu1 %v336_v19, %s954_s12  ;;  %435 = vst [vmem:[#allocation1] ss:$2 sm:$0xff] %v433_v17  ;;  %342 = vrot.lane.b32.xlu2 %v337_v18, %s954_s12  ;;  %v179_v18 = vperm.slane %v176_v13, 1 }
  0x5f   :  { %v1012_v20 = vld.sshfl [vmem:[#allocation1] sm:$0xff pattern:$0x75316420]  ;;  %v1014_v21 = vld.sshfl [vmem:[#allocation1 + $0x8] sm:$0xff pattern:$0x75316420] }
  0x60   :  { %454 = vst [vmem:[#allocation1] ss:$2 sm:$0xff] %v433_v17 }
  0x67   :  { %v455_v22 = vld.sshfl [vmem:[#allocation1] sm:$0xff pattern:$0x75316420]  ;;  %v456_v23 = vld.sshfl [vmem:[#allocation1 + $0x8] sm:$0xff pattern:$0x75316420] }
  0x68   :  { %473 = vst [vmem:[#allocation1] ss:$2 sm:$0xff] %v433_v17  ;;  %461 = vrot.lane.b32.xlu0 %v456_v23, %s948_s3  ;;  %459 = vrot.lane.b32.xlu2 %v455_v22, %s948_s3 }
  0x6f   :  { %v1018_v24 = vld.sshfl [vmem:[#allocation1 + $0x8] sm:$0xff pattern:$0x75316420]  ;;  %v474_v25 = vld.sshfl [vmem:[#allocation1] sm:$0xff pattern:$0x75316420] }
  0x70   :  { %478 = vrot.lane.b32.xlu1 %v474_v25, %s949_s7  ;;  %501 = vst [vmem:[#allocation1] ss:$2 sm:$0xff] %v433_v17 }
  0x72   :  { %v74_v35 = vpop.permute.xlu2 %73 }
  0x77   :  { %v502_v26 = vld.sshfl [vmem:[#allocation1] sm:$0xff pattern:$0x75316420]  ;;  %v503_v27 = vld.sshfl [vmem:[#allocation1 + $0x8] sm:$0xff pattern:$0x75316420] }
  0x78   :  { %508 = vrot.lane.b32.xlu1 %v503_v27, %s950_s8  ;;  %520 = vst [vmem:[#allocation1] ss:$2 sm:$0xff] %v433_v17  ;;  %506 = vrot.lane.b32.xlu0 %v502_v26, %s950_s8 }
  0x7a   :  { %v76_v48 = vpop.permute.xlu2 %75 }
  0x7b   :  { %v81_v54 = vsel %vm79_vm1, %v76_v48, %v74_v35  ;;  %v80_v57 = vsel %vm79_vm1, %v74_v35, %v76_v48 }
  0x7c   :  { %v88_v61 = vmul.f32 %v84_v50, %v81_v54  ;;  %v89_v63 = vmul.f32 %v85_v53, %v80_v57 }
  0x7f   :  { %v521_v28 = vld.sshfl [vmem:[#allocation1] sm:$0xff pattern:$0x75316420]  ;;  %v522_v29 = vld.sshfl [vmem:[#allocation1 + $0x8] sm:$0xff pattern:$0x75316420] }
  0x80   :  { %525 = vrot.lane.b32.xlu1 %v521_v28, %s951_s9  ;;  %527 = vrot.lane.b32.xlu2 %v522_v29, %s951_s9  ;;  %540 = vst [vmem:[#allocation1 + $0x1] ss:$2 sm:$0xff] %v433_v17 }
  0x87   :  { %v1025_v30 = vld.sshfl [vmem:[#allocation1] sm:$0xff pattern:$0x75316420]  ;;  %v1027_v31 = vld.sshfl [vmem:[#allocation1 + $0x8] sm:$0xff pattern:$0x75316420] }
  0x88   :  { %646 = vst [vmem:[#allocation1] ss:$2 sm:$0xff] %v433_v17 }
  0x8b   :  { %v148_v9 = vpop.permute.xlu2 %147 }
  0x8f   :  { %v647_v32 = vld.sshfl [vmem:[#allocation1] sm:$0xff pattern:$0x75316420]  ;;  %v648_v33 = vld.sshfl [vmem:[#allocation1 + $0x8] sm:$0xff pattern:$0x75316420] }
  0x90   :  { %651 = vrot.lane.b32.xlu0 %v647_v32, %s952_s10  ;;  %653 = vrot.lane.b32.xlu1 %v648_v33, %s952_s10  ;;  %665 = vst [vmem:[#allocation1] ss:$2 sm:$0xff] %v433_v17  ;;  %v327_v32 = vld [vmem:[#allocation7 + $0xe] sm:$0x3] }
  0x91   :  { %v329_v35 = vperm.slane %v327_v32, 0 }
  0x92   :  { %v96_v36 = vpop.permute.xlu0 %95 }
  0x97   :  { %v667_v39 = vld.sshfl [vmem:[#allocation1 + $0x8] sm:$0xff pattern:$0x75316420]  ;;  %v666_v40 = vld.sshfl [vmem:[#allocation1] sm:$0xff pattern:$0x75316420] }
  0x98   :  { %672 = vrot.lane.b32.xlu0 %v667_v39, %s953_s11  ;;  %670 = vrot.lane.b32.xlu2 %v666_v40, %s953_s11  ;;  %684 = vst [vmem:[#allocation1] ss:$2 sm:$0xff] %v433_v17  ;;  %v178_v17 = vperm.slane %v176_v13, 0  ;;  %v308_v40 = vperm.slane %v306_v38, 0  ;;  %v1113_v13 = vld [vmem:[#allocation5 + $0x10] sm:$0xff] }
  0x9a   :  { %v98_v43 = vpop.permute.xlu0 %97  ;;  %v117_v44 = vpop.permute.xlu1 %116 }
  0x9b   :  { %v100_v46 = vsel %vm99_vm0, %v96_v36, %v98_v43  ;;  %v101_v47 = vsel %vm99_vm0, %v98_v43, %v96_v36  ;;  %v330_v36 = vperm.slane %v327_v32, 1  ;;  %v955_v32 = vmov 0  }
  0x9c   :  { %v109_v49 = vmul.f32 %v105_v41, %v101_v47  ;;  %v110_v52 = vmul.f32 %v106_v42, %v100_v46  ;;  %v309_v41 = vperm.slane %v306_v38, 1  ;;  %836 = vset.pattern.permute.xlu2 %v955_v32  ;;  %837 = vset.pattern.permute.xlu0 %v955_v32 }
  0x9e   :  { %v134_v60 = vrot.slane %v109_v49, 4  ;;  %v135_v62 = vrot.slane %v110_v52, 4 }
  0x9f   :  { %v686_v55 = vld.sshfl [vmem:[#allocation1 + $0x8] sm:$0xff pattern:$0x75316420]  ;;  %v685_v56 = vld.sshfl [vmem:[#allocation1] sm:$0xff pattern:$0x75316420] }
  0xa0   :  { %691 = vrot.lane.b32.xlu2 %v686_v55, %s954_s12  ;;  %689 = vrot.lane.b32.xlu1 %v685_v56, %s954_s12  ;;  %v139_v10 = vsel %vm138_vm4, %v88_v61, %v134_v60  ;;  %v140_v16 = vsel %vm138_vm4, %v89_v63, %v135_v62 }
  0xa1   :  { %440 = vrot.lane.b32.xlu0 %v1012_v20, %s947_s0 }
  0xa2   :  { %v150_v0 = vpop.permute.xlu0 %149  ;;  %v119_v1 = vpop.permute.xlu1 %118 }
  0xa3   :  { %v121_v3 = vsel %vm120_vm2, %v117_v44, %v119_v1  ;;  %v122_v4 = vsel %vm120_vm2, %v119_v1, %v117_v44  ;;  %v152_v14 = vsel %vm151_vm3, %v148_v9, %v150_v0  ;;  %v153_v15 = vsel %vm151_vm3, %v150_v0, %v148_v9  ;;  %v348_v44 = vld [vmem:[#allocation7 + $0x10] sm:$0x3]  ;;  %v1103_v1 = vld [vmem:[#allocation5] sm:$0xff] }
  0xa4   :  { %v130_v5 = vmul.f32 %v126_v58, %v122_v4  ;;  %v131_v6 = vmul.f32 %v127_v59, %v121_v3  ;;  %v161_v19 = vmul.f32 %v157_v7, %v153_v15  ;;  %v162_v20 = vmul.f32 %v158_v8, %v152_v14  ;;  %v193_v0 = vld [vmem:[#allocation5 + $0x8] sm:$0xff]  ;;  %v512_v4 = vld [vmem:[#allocation7 + $0x6] sm:$0x3] }
  0xa5   :  { %v350_v47 = vperm.slane %v348_v44, 0  ;;  %v351_v48 = vperm.slane %v348_v44, 1  ;;  %v514_v7 = vperm.slane %v512_v4, 0  ;;  %v515_v8 = vperm.slane %v512_v4, 1  ;;  %v695_v44 = vld [vmem:[#allocation7 + $0x10] sm:$0x3] }
  0xa6   :  { %798 = vmatpush.msk.msra.mxu2 %vm138_vm4, %v130_v5  ;;  %800 = vmatpush.msk.msra.mxu3 %vm138_vm4, %v131_v6  ;;  %v191_v28 = vsel %vm138_vm4, %v162_v20, %v1004_v12  ;;  %v531_v6 = vld [vmem:[#allocation7 + $0xa] sm:$0x3] }
  0xa7   :  { %v533_v14 = vperm.slane %v531_v6, 0  ;;  %v534_v15 = vperm.slane %v531_v6, 1 }
  0xa8   :  { %480 = vrot.lane.b32.xlu2 %v1018_v24, %s949_s7  ;;  %442 = vrot.lane.b32.xlu1 %v1014_v21, %s947_s0  ;;  %v190_v21 = vsel %vm138_vm4, %v161_v19, %v1002_v11 }
  0xa9   :  { %268 = vmatpush.msra.mxu2 %v139_v10  ;;  %288 = vmatpush.msra.mxu3 %v140_v16 }
  0xaa   :  { %v169_v22 = vpop.permute.xlu0 %168  ;;  %v171_v23 = vpop.permute.xlu1 %170  ;;  %799 = vmatmul.msk.f32.vlgmr.msra.gmra.mxu2 %vm194_vm9, %v1103_v1  ;;  %801 = vmatmul.msk.f32.vlgmr.msra.gmra.mxu3 %vm194_vm9, %v1103_v1 }
  0xab   :  { %v173_v25 = vsel %vm172_vm5, %v169_v22, %v171_v23  ;;  %v174_v26 = vsel %vm172_vm5, %v171_v23, %v169_v22  ;;  %v320_v33 = vpop.permute.xlu2 %319 }
  0xac   :  { %v182_v24 = vmul.f32 %v178_v17, %v173_v25  ;;  %v183_v27 = vmul.f32 %v179_v18, %v174_v26 }
  0xae   :  { %794 = vmatpush.msk.msra.mxu0 %vm138_vm4, %v182_v24  ;;  %796 = vmatpush.msk.msra.mxu1 %vm138_vm4, %v183_v27 }
  0xb0   :  { %219 = vmatpush.msra.mxu0 %v190_v21  ;;  %239 = vmatpush.msra.mxu1 %v191_v28  ;;  %v484_v21 = vld [vmem:[#allocation7 + $0x4] sm:$0x3] }
  0xb1   :  { %795 = vmatmul.msk.f32.vlgmr.msra.gmra.mxu0 %vm194_vm9, %v193_v0  ;;  %797 = vmatmul.msk.f32.vlgmr.msra.gmra.mxu1 %vm194_vm9, %v193_v0  ;;  %v486_v28 = vperm.slane %v484_v21, 0 }
  0xb3   :  { %v343_v53 = vpop.permute.xlu2 %342 }
  0xba   :  { %v299_v29 = vpop.permute.xlu0 %298  ;;  %v301_v34 = vpop.permute.xlu1 %300 }
  0xbb   :  { %v303_v45 = vsel %vm302_vm7, %v299_v29, %v301_v34  ;;  %v304_v46 = vsel %vm302_vm7, %v301_v34, %v299_v29  ;;  %v487_v29 = vperm.slane %v484_v21, 1 }
  0xbc   :  { %v312_v49 = vmul.f32 %v308_v40, %v303_v45  ;;  %v313_v50 = vmul.f32 %v309_v41, %v304_v46  ;;  %v657_v45 = vld [vmem:[#allocation7 + $0xc] sm:$0x3] }
  0xc2   :  { %v322_v39 = vpop.permute.xlu0 %321  ;;  %v1097_v61 = vpop.permute.xlu2 %459 }
  0xc3   :  { %v324_v11 = vsel %vm323_vm6, %v320_v33, %v322_v39  ;;  %v325_v12 = vsel %vm323_vm6, %v322_v39, %v320_v33 }
  0xc4   :  { %v333_v42 = vmul.f32 %v329_v35, %v324_v11  ;;  %v334_v43 = vmul.f32 %v330_v36, %v325_v12  ;;  %v676_v11 = vld [vmem:[#allocation7 + $0xe] sm:$0x3] }
  0xc5   :  { %v678_v40 = vperm.slane %v676_v11, 0  ;;  %v679_v41 = vperm.slane %v676_v11, 1 }
  0xc6   :  { %v358_v51 = vrot.slane %v333_v42, 4  ;;  %v359_v52 = vrot.slane %v334_v43, 4 }
  0xc8   :  { %v362_v59 = vsel %vm138_vm4, %v312_v49, %v358_v51  ;;  %v363_v60 = vsel %vm138_vm4, %v313_v50, %v359_v52  ;;  %v698_v49 = vperm.slane %v695_v44, 1  ;;  %v465_v50 = vld [vmem:[#allocation7 + $0x2] sm:$0x3]  ;;  %v659_v51 = vperm.slane %v657_v45, 0 }
  0xc9   :  { %v660_v52 = vperm.slane %v657_v45, 1 }
  0xca   :  { %v341_v54 = vpop.permute.xlu1 %340 }
  0xcb   :  { %v345_v55 = vsel %vm344_vm8, %v341_v54, %v343_v53  ;;  %v346_v56 = vsel %vm344_vm8, %v343_v53, %v341_v54 }
  0xcc   :  { %v354_v57 = vmul.f32 %v350_v47, %v345_v55  ;;  %v355_v58 = vmul.f32 %v351_v48, %v346_v56  ;;  %v697_v48 = vperm.slane %v695_v44, 0 }
  0xce   :  { %802 = vmatpush.msk.msrb.mxu0 %vm138_vm4, %v354_v57  ;;  %804 = vmatpush.msk.msrb.mxu1 %vm138_vm4, %v355_v58 }
  0xd0   :  { %390 = vmatpush.msrb.mxu0 %v362_v59  ;;  %410 = vmatpush.msrb.mxu1 %v363_v60  ;;  %v467_v60 = vperm.slane %v465_v50, 0 }
  0xd1   :  { %803 = vmatmul.msk.f32.vlgmr.msrb.gmra.mxu0 %vm194_vm9, %v1113_v13  ;;  %805 = vmatmul.msk.f32.vlgmr.msrb.gmra.mxu1 %vm194_vm9, %v1113_v13 }
  0xda   :  { %v1099_v62 = vpop.permute.xlu0 %461  ;;  %v528_v2 = vpop.permute.xlu2 %527 }
  0xdb   :  { %v464_v4 = vsel %vm99_vm0, %v1099_v62, %v1097_v61 }
  0xe2   :  { %v479_v63 = vpop.permute.xlu1 %478 }
  0xea   :  { %v509_v3 = vpop.permute.xlu1 %508  ;;  %v507_v5 = vpop.permute.xlu0 %506 }
  0xeb   :  { %v510_v9 = vsel %vm151_vm3, %v507_v5, %v509_v3  ;;  %v511_v10 = vsel %vm151_vm3, %v509_v3, %v507_v5  ;;  %v463_v3 = vsel %vm99_vm0, %v1097_v61, %v1099_v62 }
  0xec   :  { %v518_v16 = vmul.f32 %v514_v7, %v511_v10  ;;  %v519_v17 = vmul.f32 %v515_v8, %v510_v9  ;;  %v446_v7 = vld [vmem:[#allocation7] sm:$0x3]  ;;  %v471_v10 = vmul.f32 %v467_v60, %v464_v4 }
  0xee   :  { %v545_v26 = vsel %vm138_vm4, %v518_v16, %v1025_v30  ;;  %v546_v24 = vsel %vm138_vm4, %v519_v17, %v1027_v31  ;;  %v65_v30 = vld [vmem:[%s1184_s2] sm:$0xff]  ;;  %v448_v16 = vperm.slane %v446_v7, 0  ;;  %v449_v17 = vperm.slane %v446_v7, 1  ;;  %s956_s2 = smov [#allocation8]  }
  0xef   :  { %419 = vperm.xlu2 %836, %v65_v30   ;;  %s778_s15 = sshll.u32 %s956_s2, 4  ;;  %s779_s15 = int_to_ptr.vmem [resolvable:$true] %s778_s15 }
  0xf2   :  { %v671_v18 = vpop.permute.xlu2 %670  ;;  %v526_v19 = vpop.permute.xlu1 %525 }
  0xf3   :  { %v529_v20 = vsel %vm172_vm5, %v526_v19, %v528_v2  ;;  %v530_v22 = vsel %vm172_vm5, %v528_v2, %v526_v19  ;;  %v494_v19 = vrot.slane %v471_v10, 4 }
  0xf4   :  { %v537_v23 = vmul.f32 %v533_v14, %v529_v20  ;;  %v538_v25 = vmul.f32 %v534_v15, %v530_v22 }
  0xf6   :  { %806 = vmatpush.msk.msrb.mxu2 %vm138_vm4, %v537_v23  ;;  %808 = vmatpush.msk.msrb.mxu3 %vm138_vm4, %v538_v25 }
  0xf8   :  { %572 = vmatpush.msrb.mxu2 %v545_v26  ;;  %592 = vmatpush.msrb.mxu3 %v546_v24 }
  0xf9   :  { %807 = vmatmul.msk.f32.vlgmr.msrb.gmra.mxu2 %vm194_vm9, %v193_v0  ;;  %809 = vmatmul.msk.f32.vlgmr.msrb.gmra.mxu3 %vm194_vm9, %v193_v0 }
  0xfa   :  { %v692_v27 = vpop.permute.xlu2 %691 }
 0x102   :  { %v652_v31 = vpop.permute.xlu0 %651  ;;  %v481_v33 = vpop.permute.xlu2 %480 }
 0x103   :  { %v482_v34 = vsel %vm120_vm2, %v479_v63, %v481_v33  ;;  %v483_v35 = vsel %vm120_vm2, %v481_v33, %v479_v63  ;;  %v654_v39 = vpop.permute.xlu1 %653  ;;  %v468_v63 = vperm.slane %v465_v50, 1 }
 0x104   :  { %v490_v36 = vmul.f32 %v486_v28, %v483_v35  ;;  %v491_v38 = vmul.f32 %v487_v29, %v482_v34  ;;  %v655_v53 = vsel %vm302_vm7, %v652_v31, %v654_v39  ;;  %v656_v54 = vsel %vm302_vm7, %v654_v39, %v652_v31 }
 0x105   :  { %v663_v5 = vmul.f32 %v659_v51, %v655_v53  ;;  %v664_v6 = vmul.f32 %v660_v52, %v656_v54  ;;  %v472_v14 = vmul.f32 %v468_v63, %v463_v3 }
 0x106   :  { %810 = vmatpush.msk.msra.mxu0 %vm138_vm4, %v490_v36  ;;  %812 = vmatpush.msk.msra.mxu1 %vm138_vm4, %v491_v38 }
 0x107   :  { %v495_v20 = vrot.slane %v472_v14, 4 }
 0x10a   :  { %v673_v12 = vpop.permute.xlu0 %672 }
 0x10b   :  { %v674_v42 = vsel %vm323_vm6, %v671_v18, %v673_v12  ;;  %v675_v43 = vsel %vm323_vm6, %v673_v12, %v671_v18 }
 0x10c   :  { %v682_v46 = vmul.f32 %v678_v40, %v674_v42  ;;  %v683_v47 = vmul.f32 %v679_v41, %v675_v43 }
 0x10e   :  { %v705_v56 = vrot.slane %v682_v46, 4  ;;  %v706_v57 = vrot.slane %v683_v47, 4 }
 0x110   :  { %v709_v8 = vsel %vm138_vm4, %v663_v5, %v705_v56  ;;  %v710_v9 = vsel %vm138_vm4, %v664_v6, %v706_v57 }
 0x112   :  { %v690_v55 = vpop.permute.xlu1 %689 }
 0x113   :  { %v693_v58 = vsel %vm344_vm8, %v690_v55, %v692_v27  ;;  %v694_v59 = vsel %vm344_vm8, %v692_v27, %v690_v55  ;;  %v441_v15 = vpop.permute.xlu0 %440 }
 0x114   :  { %v701_v0 = vmul.f32 %v697_v48, %v693_v58  ;;  %v702_v2 = vmul.f32 %v698_v49, %v694_v59 }
 0x116   :  { %814 = vmatpush.msk.msra.mxu2 %vm138_vm4, %v701_v0  ;;  %816 = vmatpush.msk.msra.mxu3 %vm138_vm4, %v702_v2 }
 0x118   :  { %736 = vmatpush.msra.mxu2 %v709_v8  ;;  %756 = vmatpush.msra.mxu3 %v710_v9 }
 0x119   :  { %815 = vmatmul.msk.f32.vlgmr.msra.gmra.mxu2 %vm194_vm9, %v1113_v13  ;;  %817 = vmatmul.msk.f32.vlgmr.msra.gmra.mxu3 %vm194_vm9, %v1113_v13 }
 0x11a   :  { %v443_v61 = vpop.permute.xlu1 %442 }
 0x11b   :  { %v444_v62 = vsel %vm79_vm1, %v441_v15, %v443_v61  ;;  %v445_v18 = vsel %vm79_vm1, %v443_v61, %v441_v15 }
 0x11c   :  { %v452_v22 = vmul.f32 %v448_v16, %v445_v18  ;;  %v453_v23 = vmul.f32 %v449_v17, %v444_v62 }
 0x11e   :  { %v498_v25 = vsel %vm138_vm4, %v452_v22, %v494_v19  ;;  %v499_v26 = vsel %vm138_vm4, %v453_v23, %v495_v20 }
 0x11f   :  { %621 = vmatpush.msra.mxu0 %v498_v25  ;;  %641 = vmatpush.msra.mxu1 %v499_v26 }
 0x120   :  { %811 = vmatmul.msk.f32.vlgmr.msra.gmra.mxu0 %vm194_vm9, %v1103_v1  ;;  %813 = vmatmul.msk.f32.vlgmr.msra.gmra.mxu1 %vm194_vm9, %v1103_v1 }
 0x12d   :  { %v270_v37 = vpop.f32.mrf.mxu2  ;;  %v290_v27 = vpop.f32.mrf.mxu3 }
 0x12e   :  { %v221_v13 = vpop.f32.mrf.mxu0  ;;  %v241_v24 = vpop.f32.mrf.mxu1 }
 0x12f   :  { %v271_v21 = vadd.f32 %v270_v37, %v221_v13  ;;  %v291_v28 = vadd.f32 %v290_v27, %v241_v24 }
 0x149   :  { %v420_v29 = vpop.permute.xlu2 %419 }
 0x14e   :  { %v392_v30 = vpop.f32.mrf.mxu0  ;;  %v412_v32 = vpop.f32.mrf.mxu1 }
 0x14f   :  { %v415_v31 = vadd.f32 %v392_v30, %v271_v21  ;;  %v416_v33 = vadd.f32 %v412_v32, %v291_v28 }
 0x151   :  { %v422_v34 = vadd.f32 %v420_v29, %v415_v31  ;;  %v423_v35 = vadd.f32 %v420_v29, %v416_v33 }
 0x153   :  { %vm424_vm10 = vcmp.ge.f32.partialorder %v422_v34, 0.0  ;;  %vm425_vm11 = vcmp.ge.f32.partialorder %v423_v35, 0.0  ;;  %v426_v36 = vmul.f32 0.2, %v422_v34  ;;  %v427_v38 = vmul.f32 0.2, %v423_v35 }
 0x155   :  { %v428_v39 = vsel %vm424_vm10, %v422_v34, %v426_v36  ;;  %v429_v11 = vsel %vm425_vm11, %v423_v35, %v427_v38 }
 0x156   :  { %430 = vst [vmem:[#allocation8] sm:$0xff] %v428_v39 }
 0x157   :  { %431 = vst [vmem:[#allocation8 + $0x8] sm:$0xff] %v429_v11 }
 0x17c   :  { %v574_v1 = vpop.f32.mrf.mxu2  ;;  %v594_v12 = vpop.f32.mrf.mxu3 }
 0x19c   :  { %v738_v40 = vpop.f32.mrf.mxu2  ;;  %v758_v41 = vpop.f32.mrf.mxu3 }
 0x19d   :  { %v623_v42 = vpop.f32.mrf.mxu0  ;;  %v643_v43 = vpop.f32.mrf.mxu1 }
 0x19e   :  { %v624_v44 = vadd.f32 %v623_v42, %v574_v1  ;;  %v644_v45 = vadd.f32 %v643_v43, %v594_v12 }
 0x1a0   :  { %v761_v46 = vadd.f32 %v738_v40, %v624_v44  ;;  %v762_v47 = vadd.f32 %v758_v41, %v644_v45 }
 0x1a2   :  { %v763_v48 = vadd.f32 %v761_v46, %v420_v29  ;;  %v764_v49 = vadd.f32 %v762_v47, %v420_v29 }
 0x1a4   :  { %vm765_vm12 = vcmp.ge.f32.partialorder %v763_v48, 0.0  ;;  %v767_v50 = vmul.f32 0.2, %v763_v48  ;;  %vm766_vm13 = vcmp.ge.f32.partialorder %v764_v49, 0.0  ;;  %v768_v51 = vmul.f32 0.2, %v764_v49 }
 0x1a6   :  { %v769_v52 = vsel %vm765_vm12, %v763_v48, %v767_v50  ;;  %v770_v53 = vsel %vm766_vm13, %v764_v49, %v768_v51 }
 0x1a7   :  { %772 = vst [vmem:[#allocation8 + $0x10] sm:$0xff] %v769_v52 }
 0x1a8   :  { %773 = vst [vmem:[#allocation8 + $0x18] sm:$0xff] %v770_v53 }
 0x1a9   :  { %786 = dma.vmem_to_hbm [thread:$0]  %s779_s15, 512, %s781_s18, [#allocation4], %s957_s19, %s957_s19, %s948_s3  }
 0x1aa   :  { %938 = dma.done.wait [#allocation4], 512  }
 0x1ab   :  { %939 = vsyncadd [#allocation4], 4294966784 }
 0x1ac   :  { %791 = vsyncpa [#allocation3], 1 }
 0x1ad   :  { %792 = vsyncpa [#allocation6], 1 }
 0x1ae   :  { %793 = vsyncpa [#allocation4], 1 }

</bundles_post_ra>
